<compile_context>
chip_gen: v6e
topology: v6e:2x2x1
jax: 0.10.0
libtpu: 0.0.40
codegen_flags: <defaults>
</compile_context>

<pallas_src>
import jax
import jax.numpy as jnp
from jax import lax
from jax.experimental import pallas as pl
from jax.experimental.pallas import tpu as pltpu


# ------------------------------- Pallas kernel -------------------------------

def _make_kernel(H, W, c):
    """Fused ShuffleBlock kernel for static H, W and half-channel count c."""
    HW = H * W
    taps = [(dy, dx) for dy in (-1, 0, 1) for dx in (-1, 0, 1)]

    def kernel(x_ref, w1_ref, b1_ref, wdm_ref, b2_ref,
               w3_ref, b3_ref, p_ref, o_ref):
        Bt = o_ref.shape[0]
        x1 = x_ref[:, 0]                          # (Bt, c, HW) passthrough half
        x2 = x_ref[:, 1]                          # (Bt, c, HW) branch2 input

        # ---- 1x1 conv (BN scale folded) + bias + ReLU, on the MXU ----------
        w1b = jnp.broadcast_to(w1_ref[...], (Bt, c, c))
        y = jnp.einsum('boi,bip->bop', w1b, x2,
                       preferred_element_type=jnp.float32)
        y = jnp.maximum(y + b1_ref[...], 0.0)     # (Bt, c, HW)

        # ---- 3x3 depthwise, stride 1, pad 1 ---------------------------------
        # Lane rolls (XLU) + pre-masked, BN-folded weights (9, c, HW):
        # no jnp.where selects, no padded VMEM scratch.  Fixed 9-tap unroll.
        z = None
        for t, (dy, dx) in enumerate(taps):
            off = dy * W + dx
            shifted = y if off == 0 else pltpu.roll(y, shift=(-off) % HW, axis=2)
            term = wdm_ref[t] * shifted
            z = term if z is None else z + term
        z = z + b2_ref[...]                       # BN shift, no ReLU here

        # ---- second 1x1 conv + ReLU with channel_shuffle folded in ----------
        # w3big has branch2 weights on the ODD output rows (even rows zero,
        # even bias zero -> relu gives exactly 0 there).
        w3b = jnp.broadcast_to(w3_ref[...], (Bt, 2 * c, c))
        br = jnp.einsum('boi,bip->bop', w3b, z,
                        preferred_element_type=jnp.float32)
        br = jnp.maximum(br + b3_ref[...], 0.0)   # (Bt, 2c, HW)

        # x1 passthrough scattered onto the EVEN output rows by a one-hot
        # (2c, c) matrix -- a free matmul on the otherwise idle MXU.
        pb = jnp.broadcast_to(p_ref[...], (Bt, 2 * c, c))
        x1s = jnp.einsum('boi,bip->bop', pb, x1,
                         preferred_element_type=jnp.float32)

        # Single full-tile, lane-dense store of the already-shuffled output:
        #   out[:, 2j] = x1[:, j],  out[:, 2j+1] = branch2[:, j]
        o_ref[...] = x1s + br

    return kernel


def _pick_batch_tile(B, c, HW, itemsize=4, budget_bytes=24 * 1024 * 1024):
    """Largest batch tile such that double-buffered IO blocks plus the live
    f32 intermediates fit in ~budget_bytes of VMEM, while keeping the grid
    with >= 2 steps whenever B >= 2 (so 'parallel' can shard the batch axis
    across the two TensorCores on v7x)."""
    cpad = -(-c // 8) * 8                            # sublane padding of c
    c2pad = -(-(2 * c) // 8) * 8
    in_blk = 2 * cpad * HW * itemsize                # (Bt, 2, c, HW) per image
    out_blk = c2pad * HW * itemsize                  # (Bt, 2c, HW)   per image
    live = 6 * cpad * HW * itemsize                  # y, z, shifted, br, x1s, slack
    per_img = 2 * (in_blk + out_blk) + live          # x2: double-buffered IO
    bt = max(1, min(B, budget_bytes // max(per_img, 1)))
    if B >= 2:
        bt = min(bt, B // 2)                         # keep grid >= 2 for v7x
    while B % bt != 0:
        bt -= 1
    return max(bt, 1)


def _shuffle_block_pallas(x_split, w1f, b1f, wdm, b2f, w3big, b3big, pshuf,
                          H, W, c):
    B = x_split.shape[0]
    HW = H * W
    C2 = 2 * c
    Bt = _pick_batch_tile(B, c, HW)
    kernel = _make_kernel(H, W, c)

    def full(a):
        nd = a.ndim
        return pl.BlockSpec(a.shape, lambda b, _nd=nd: (0,) * _nd)

    return pl.pallas_call(
        kernel,
        out_shape=jax.ShapeDtypeStruct((B, C2, HW), jnp.float32),
        grid_spec=pltpu.PrefetchScalarGridSpec(
            num_scalar_prefetch=0,
            grid=(B // Bt,),
            in_specs=[
                pl.BlockSpec((Bt, 2, c, HW), lambda b: (b, 0, 0, 0)),  # x
                full(w1f), full(b1f),          # conv1 (BN folded) / bias
                full(wdm), full(b2f),          # pre-masked depthwise / bias
                full(w3big), full(b3big),      # conv3+shuffle folded / bias
                full(pshuf),                   # x1 -> even-channel scatter
            ],
            out_specs=pl.BlockSpec((Bt, C2, HW), lambda b: (b, 0, 0)),
        ),
        compiler_params=pltpu.CompilerParams(
            dimension_semantics=("parallel",),
            vmem_limit_bytes=64 * 1024 * 1024),
    )(x_split, w1f, b1f, wdm, b2f, w3big, b3big, pshuf)


# ------------------------------- parameters ----------------------------------

def init_params(key, half_c):
    ks = jax.random.split(key, 6)

    def bn(k):
        k1, k2, k3, k4 = jax.random.split(k, 4)
        gamma = 1.0 + 0.1 * jax.random.normal(k1, (half_c,), jnp.float32)
        beta = 0.1 * jax.random.normal(k2, (half_c,), jnp.float32)
        mean = 0.1 * jax.random.normal(k3, (half_c,), jnp.float32)
        var = 1.0 + 0.5 * jax.random.uniform(k4, (half_c,), jnp.float32)
        return gamma, beta, mean, var

    return dict(
        conv1=0.5 * jax.random.normal(ks[0], (half_c, half_c, 1, 1), jnp.float32),
        dw=0.5 * jax.random.normal(ks[1], (half_c, 1, 3, 3), jnp.float32),
        conv3=0.5 * jax.random.normal(ks[2], (half_c, half_c, 1, 1), jnp.float32),
        bn1=bn(ks[3]), bn2=bn(ks[4]), bn3=bn(ks[5]),
    )


def fold_bn(bn, eps=1e-5):
    gamma, beta, mean, var = bn
    scale = gamma / jnp.sqrt(var + eps)
    shift = beta - mean * scale
    return scale, shift


# --------------------------- forward (wrapper glue) ---------------------------

def shuffle_block_forward(x_nchw, params):
    """ShuffleBlock(in_c, out_c=in_c, downsample=False).forward"""
    B, Cin, H, W = x_nchw.shape
    c = Cin // 2
    HW = H * W

    s1, b1 = fold_bn(params['bn1'])
    s2, b2 = fold_bn(params['bn2'])
    s3, b3 = fold_bn(params['bn3'])

    w1 = params['conv1'][:, :, 0, 0]                 # (out, in) = (c, c)
    w3 = params['conv3'][:, :, 0, 0]
    dw = params['dw'][:, 0]                          # (c, 3, 3)

    # One-time weight preprocessing (all BN scales folded into conv weights).
    w1f = s1[:, None] * w1                           # (c, c)  'oi'
    b1f = b1[:, None]                                # (c, 1)

    # Depthwise: fold BN scale AND the zero-pad border masks into (9, c, HW).
    pos = jnp.arange(HW, dtype=jnp.int32)
    hi, wi = pos // W, pos % W
    taps = [(dy, dx) for dy in (-1, 0, 1) for dx in (-1, 0, 1)]
    masks = jnp.stack(
        [((hi + dy >= 0) & (hi + dy < H) & (wi + dx >= 0) & (wi + dx < W))
         .astype(jnp.float32) for dy, dx in taps], axis=0)      # (9, HW)
    wdf = (s2[:, None, None] * dw).reshape(c, 9).T              # (9, c)
    wdm = wdf[:, :, None] * masks[:, None, :]                   # (9, c, HW)
    b2f = b2[:, None]                                           # (c, 1)

    # Second 1x1 conv with channel_shuffle(groups=2) folded into the weights:
    # branch2 lands on odd output channels, x1 is scattered to even channels.
    w3f = s3[:, None] * w3                                      # (c, c)
    w3big = jnp.zeros((2 * c, c), jnp.float32).at[1::2, :].set(w3f)
    b3big = jnp.zeros((2 * c, 1), jnp.float32).at[1::2, 0].set(b3)
    pshuf = jnp.zeros((2 * c, c), jnp.float32).at[
        jnp.arange(0, 2 * c, 2), jnp.arange(c)].set(1.0)

    # (B, 2c, H, W) -> (B, 2, c, HW): free reshape; branch halves become a
    # clean leading index inside the kernel (no mid-tile sublane slice).
    x_split = x_nchw.reshape(B, 2, c, HW)

    out = _shuffle_block_pallas(x_split, w1f, b1f, wdm, b2f,
                                w3big, b3big, pshuf, H, W, c)
    return out.reshape(B, Cin, H, W)                 # free reshape


# ------------------------------ pure-JAX reference ----------------------------

def channel_shuffle(x_nchw, groups=2):
    B, C, H, W = x_nchw.shape
    x = x_nchw.reshape(B, groups, C // groups, H, W)
    x = jnp.transpose(x, (0, 2, 1, 3, 4))
    return x.reshape(B, C, H, W)


def reference_forward(x_nchw, params):
    B, Cin, H, W = x_nchw.shape
    c = Cin // 2
    x1, x2 = x_nchw[:, :c], x_nchw[:, c:]
    dn = ('NCHW', 'OIHW', 'NCHW')
    hp = lax.Precision.HIGHEST

    def bn_apply(y, bn):
        s, t = fold_bn(bn)
        return y * s[None, :, None, None] + t[None, :, None, None]

    y = lax.conv_general_dilated(x2, params['conv1'], (1, 1), 'VALID',
                                 dimension_numbers=dn, precision=hp)
    y = jax.nn.relu(bn_apply(y, params['bn1']))
    y = lax.conv_general_dilated(y, params['dw'], (1, 1), ((1, 1), (1, 1)),
                                 dimension_numbers=dn, feature_group_count=c,
                                 precision=hp)
    y = bn_apply(y, params['bn2'])
    y = lax.conv_general_dilated(y, params['conv3'], (1, 1), 'VALID',
                                 dimension_numbers=dn, precision=hp)
    y = jax.nn.relu(bn_apply(y, params['bn3']))
    out = jnp.concatenate([x1, y], axis=1)
    return channel_shuffle(out, groups=2)


# ----------------------------------- main -------------------------------------

if __name__ == "__main__":
    key = jax.random.PRNGKey(0)
    kx, kp = jax.random.split(key)

    B, C, H, W = 2, 8, 16, 16          # in_c == out_c == 8, downsample=False
    x = jax.random.normal(kx, (B, C, H, W), jnp.float32)
    params = init_params(kp, C // 2)

    out = jax.block_until_ready(shuffle_block_forward(x, params))

    ref = reference_forward(x, params)
    assert out.shape == (B, C, H, W)
    err = float(jnp.max(jnp.abs(out - ref)))
    assert jnp.allclose(out, ref, rtol=1e-3, atol=1e-3), f"max abs err {err}"

    print("KERNEL_OK")
</pallas_src>

<mosaic_0001>
module attributes {stable_mosaic.version = 11 : i64} {
  func.func @kernel(%arg0: i32, %arg1: memref<1x2x4x256xf32, #tpu.memory_space<vmem>>, %arg2: memref<4x4xf32, #tpu.memory_space<vmem>>, %arg3: memref<4x1xf32, #tpu.memory_space<vmem>>, %arg4: memref<9x4x256xf32, #tpu.memory_space<vmem>>, %arg5: memref<4x1xf32, #tpu.memory_space<vmem>>, %arg6: memref<8x4xf32, #tpu.memory_space<vmem>>, %arg7: memref<8x1xf32, #tpu.memory_space<vmem>>, %arg8: memref<8x4xf32, #tpu.memory_space<vmem>>, %arg9: memref<1x8x256xf32, #tpu.memory_space<vmem>>) attributes {dimension_semantics = [#tpu.dimension_semantics<parallel>], iteration_bounds = array<i64: 2>, scalar_prefetch = 0 : i64, scratch_operands = 0 : i64, tpu.core_type = #tpu.core_type<tc>, window_params = [{transform_indices = @transform_0, window_bounds = array<i64: 1, 2, 4, 256>}, {pipeline_mode = #tpu.pipeline_mode<synchronous>, transform_indices = @transform_1, window_bounds = array<i64: 4, 4>}, {pipeline_mode = #tpu.pipeline_mode<synchronous>, transform_indices = @transform_2, window_bounds = array<i64: 4, 1>}, {pipeline_mode = #tpu.pipeline_mode<synchronous>, transform_indices = @transform_3, window_bounds = array<i64: 9, 4, 256>}, {pipeline_mode = #tpu.pipeline_mode<synchronous>, transform_indices = @transform_4, window_bounds = array<i64: 4, 1>}, {pipeline_mode = #tpu.pipeline_mode<synchronous>, transform_indices = @transform_5, window_bounds = array<i64: 8, 4>}, {pipeline_mode = #tpu.pipeline_mode<synchronous>, transform_indices = @transform_6, window_bounds = array<i64: 8, 1>}, {pipeline_mode = #tpu.pipeline_mode<synchronous>, transform_indices = @transform_7, window_bounds = array<i64: 8, 4>}, {transform_indices = @transform_8, window_bounds = array<i64: 1, 8, 256>}]} {
    %c0 = arith.constant 0 : index
    %c0_0 = arith.constant 0 : index
    %c0_1 = arith.constant 0 : index
    %c0_2 = arith.constant 0 : index
    %0 = vector.load %arg1[%c0, %c0_0, %c0_1, %c0_2] : memref<1x2x4x256xf32, #tpu.memory_space<vmem>>, vector<1x1x4x256xf32>
    %1 = vector.shape_cast %0 : vector<1x1x4x256xf32> to vector<1x4x256xf32>
    %c0_3 = arith.constant 0 : index
    %c1 = arith.constant 1 : index
    %c0_4 = arith.constant 0 : index
    %c0_5 = arith.constant 0 : index
    %2 = vector.load %arg1[%c0_3, %c1, %c0_4, %c0_5] : memref<1x2x4x256xf32, #tpu.memory_space<vmem>>, vector<1x1x4x256xf32>
    %3 = vector.shape_cast %2 : vector<1x1x4x256xf32> to vector<1x4x256xf32>
    %c0_6 = arith.constant 0 : index
    %c0_7 = arith.constant 0 : index
    %4 = vector.load %arg2[%c0_6, %c0_7] : memref<4x4xf32, #tpu.memory_space<vmem>>, vector<4x4xf32>
    %5 = vector.shape_cast %4 : vector<4x4xf32> to vector<1x4x4xf32>
    "tpu.trace_start"() <{level = 10 : i32, message = "boi,bip->bop"}> : () -> ()
    %cst = arith.constant dense<0.000000e+00> : vector<1x4x256xf32>
    %6 = tpu.matmul %5, %3, %cst {dimension_numbers = #tpu.dot_dimension_numbers<[2], [1], [1], [2], [0, 0, 0, 1, 1, 2], [0], [0]>} : vector<1x4x4xf32>, vector<1x4x256xf32>, vector<1x4x256xf32> -> vector<1x4x256xf32>
    "tpu.trace_stop"() : () -> ()
    %c0_8 = arith.constant 0 : index
    %c0_9 = arith.constant 0 : index
    %7 = vector.load %arg3[%c0_8, %c0_9] : memref<4x1xf32, #tpu.memory_space<vmem>>, vector<4x1xf32>
    %8 = vector.shape_cast %7 : vector<4x1xf32> to vector<1x4x1xf32>
    %9 = vector.broadcast %8 : vector<1x4x1xf32> to vector<1x4x256xf32>
    %10 = arith.addf %6, %9 : vector<1x4x256xf32>
    %cst_10 = arith.constant 0.000000e+00 : f32
    %11 = vector.broadcast %cst_10 : f32 to vector<1x4x256xf32>
    %12 = arith.maximumf %10, %11 : vector<1x4x256xf32>
    %c17_i32 = arith.constant 17 : i32
    %13 = tpu.dynamic_rotate %12 by %c17_i32 dim 2 : vector<1x4x256xf32>, i32 -> vector<1x4x256xf32>
    %c0_11 = arith.constant 0 : index
    %c0_12 = arith.constant 0 : index
    %c0_13 = arith.constant 0 : index
    %14 = vector.load %arg4[%c0_11, %c0_12, %c0_13] : memref<9x4x256xf32, #tpu.memory_space<vmem>>, vector<1x4x256xf32>
    %15 = vector.shape_cast %14 : vector<1x4x256xf32> to vector<4x256xf32>
    %16 = vector.shape_cast %15 : vector<4x256xf32> to vector<1x4x256xf32>
    %17 = arith.mulf %16, %13 : vector<1x4x256xf32>
    %c16_i32 = arith.constant 16 : i32
    %18 = tpu.dynamic_rotate %12 by %c16_i32 dim 2 : vector<1x4x256xf32>, i32 -> vector<1x4x256xf32>
    %c1_14 = arith.constant 1 : index
    %c0_15 = arith.constant 0 : index
    %c0_16 = arith.constant 0 : index
    %19 = vector.load %arg4[%c1_14, %c0_15, %c0_16] : memref<9x4x256xf32, #tpu.memory_space<vmem>>, vector<1x4x256xf32>
    %20 = vector.shape_cast %19 : vector<1x4x256xf32> to vector<4x256xf32>
    %21 = vector.shape_cast %20 : vector<4x256xf32> to vector<1x4x256xf32>
    %22 = arith.mulf %21, %18 : vector<1x4x256xf32>
    %23 = arith.addf %17, %22 : vector<1x4x256xf32>
    %c15_i32 = arith.constant 15 : i32
    %24 = tpu.dynamic_rotate %12 by %c15_i32 dim 2 : vector<1x4x256xf32>, i32 -> vector<1x4x256xf32>
    %c2 = arith.constant 2 : index
    %c0_17 = arith.constant 0 : index
    %c0_18 = arith.constant 0 : index
    %25 = vector.load %arg4[%c2, %c0_17, %c0_18] : memref<9x4x256xf32, #tpu.memory_space<vmem>>, vector<1x4x256xf32>
    %26 = vector.shape_cast %25 : vector<1x4x256xf32> to vector<4x256xf32>
    %27 = vector.shape_cast %26 : vector<4x256xf32> to vector<1x4x256xf32>
    %28 = arith.mulf %27, %24 : vector<1x4x256xf32>
    %29 = arith.addf %23, %28 : vector<1x4x256xf32>
    %c1_i32 = arith.constant 1 : i32
    %30 = tpu.dynamic_rotate %12 by %c1_i32 dim 2 : vector<1x4x256xf32>, i32 -> vector<1x4x256xf32>
    %c3 = arith.constant 3 : index
    %c0_19 = arith.constant 0 : index
    %c0_20 = arith.constant 0 : index
    %31 = vector.load %arg4[%c3, %c0_19, %c0_20] : memref<9x4x256xf32, #tpu.memory_space<vmem>>, vector<1x4x256xf32>
    %32 = vector.shape_cast %31 : vector<1x4x256xf32> to vector<4x256xf32>
    %33 = vector.shape_cast %32 : vector<4x256xf32> to vector<1x4x256xf32>
    %34 = arith.mulf %33, %30 : vector<1x4x256xf32>
    %35 = arith.addf %29, %34 : vector<1x4x256xf32>
    %c4 = arith.constant 4 : index
    %c0_21 = arith.constant 0 : index
    %c0_22 = arith.constant 0 : index
    %36 = vector.load %arg4[%c4, %c0_21, %c0_22] : memref<9x4x256xf32, #tpu.memory_space<vmem>>, vector<1x4x256xf32>
    %37 = vector.shape_cast %36 : vector<1x4x256xf32> to vector<4x256xf32>
    %38 = vector.shape_cast %37 : vector<4x256xf32> to vector<1x4x256xf32>
    %39 = arith.mulf %38, %12 : vector<1x4x256xf32>
    %40 = arith.addf %35, %39 : vector<1x4x256xf32>
    %c255_i32 = arith.constant 255 : i32
    %41 = tpu.dynamic_rotate %12 by %c255_i32 dim 2 : vector<1x4x256xf32>, i32 -> vector<1x4x256xf32>
    %c5 = arith.constant 5 : index
    %c0_23 = arith.constant 0 : index
    %c0_24 = arith.constant 0 : index
    %42 = vector.load %arg4[%c5, %c0_23, %c0_24] : memref<9x4x256xf32, #tpu.memory_space<vmem>>, vector<1x4x256xf32>
    %43 = vector.shape_cast %42 : vector<1x4x256xf32> to vector<4x256xf32>
    %44 = vector.shape_cast %43 : vector<4x256xf32> to vector<1x4x256xf32>
    %45 = arith.mulf %44, %41 : vector<1x4x256xf32>
    %46 = arith.addf %40, %45 : vector<1x4x256xf32>
    %c241_i32 = arith.constant 241 : i32
    %47 = tpu.dynamic_rotate %12 by %c241_i32 dim 2 : vector<1x4x256xf32>, i32 -> vector<1x4x256xf32>
    %c6 = arith.constant 6 : index
    %c0_25 = arith.constant 0 : index
    %c0_26 = arith.constant 0 : index
    %48 = vector.load %arg4[%c6, %c0_25, %c0_26] : memref<9x4x256xf32, #tpu.memory_space<vmem>>, vector<1x4x256xf32>
    %49 = vector.shape_cast %48 : vector<1x4x256xf32> to vector<4x256xf32>
    %50 = vector.shape_cast %49 : vector<4x256xf32> to vector<1x4x256xf32>
    %51 = arith.mulf %50, %47 : vector<1x4x256xf32>
    %52 = arith.addf %46, %51 : vector<1x4x256xf32>
    %c240_i32 = arith.constant 240 : i32
    %53 = tpu.dynamic_rotate %12 by %c240_i32 dim 2 : vector<1x4x256xf32>, i32 -> vector<1x4x256xf32>
    %c7 = arith.constant 7 : index
    %c0_27 = arith.constant 0 : index
    %c0_28 = arith.constant 0 : index
    %54 = vector.load %arg4[%c7, %c0_27, %c0_28] : memref<9x4x256xf32, #tpu.memory_space<vmem>>, vector<1x4x256xf32>
    %55 = vector.shape_cast %54 : vector<1x4x256xf32> to vector<4x256xf32>
    %56 = vector.shape_cast %55 : vector<4x256xf32> to vector<1x4x256xf32>
    %57 = arith.mulf %56, %53 : vector<1x4x256xf32>
    %58 = arith.addf %52, %57 : vector<1x4x256xf32>
    %c239_i32 = arith.constant 239 : i32
    %59 = tpu.dynamic_rotate %12 by %c239_i32 dim 2 : vector<1x4x256xf32>, i32 -> vector<1x4x256xf32>
    %c8 = arith.constant 8 : index
    %c0_29 = arith.constant 0 : index
    %c0_30 = arith.constant 0 : index
    %60 = vector.load %arg4[%c8, %c0_29, %c0_30] : memref<9x4x256xf32, #tpu.memory_space<vmem>>, vector<1x4x256xf32>
    %61 = vector.shape_cast %60 : vector<1x4x256xf32> to vector<4x256xf32>
    %62 = vector.shape_cast %61 : vector<4x256xf32> to vector<1x4x256xf32>
    %63 = arith.mulf %62, %59 : vector<1x4x256xf32>
    %64 = arith.addf %58, %63 : vector<1x4x256xf32>
    %c0_31 = arith.constant 0 : index
    %c0_32 = arith.constant 0 : index
    %65 = vector.load %arg5[%c0_31, %c0_32] : memref<4x1xf32, #tpu.memory_space<vmem>>, vector<4x1xf32>
    %66 = vector.shape_cast %65 : vector<4x1xf32> to vector<1x4x1xf32>
    %67 = vector.broadcast %66 : vector<1x4x1xf32> to vector<1x4x256xf32>
    %68 = arith.addf %64, %67 : vector<1x4x256xf32>
    %c0_33 = arith.constant 0 : index
    %c0_34 = arith.constant 0 : index
    %69 = vector.load %arg6[%c0_33, %c0_34] : memref<8x4xf32, #tpu.memory_space<vmem>>, vector<8x4xf32>
    %70 = vector.shape_cast %69 : vector<8x4xf32> to vector<1x8x4xf32>
    "tpu.trace_start"() <{level = 10 : i32, message = "boi,bip->bop"}> : () -> ()
    %cst_35 = arith.constant dense<0.000000e+00> : vector<1x8x256xf32>
    %71 = tpu.matmul %70, %68, %cst_35 {dimension_numbers = #tpu.dot_dimension_numbers<[2], [1], [1], [2], [0, 0, 0, 1, 1, 2], [0], [0]>} : vector<1x8x4xf32>, vector<1x4x256xf32>, vector<1x8x256xf32> -> vector<1x8x256xf32>
    "tpu.trace_stop"() : () -> ()
    %c0_36 = arith.constant 0 : index
    %c0_37 = arith.constant 0 : index
    %72 = vector.load %arg7[%c0_36, %c0_37] : memref<8x1xf32, #tpu.memory_space<vmem>>, vector<8x1xf32>
    %73 = vector.shape_cast %72 : vector<8x1xf32> to vector<1x8x1xf32>
    %74 = vector.broadcast %73 : vector<1x8x1xf32> to vector<1x8x256xf32>
    %75 = arith.addf %71, %74 : vector<1x8x256xf32>
    %cst_38 = arith.constant 0.000000e+00 : f32
    %76 = vector.broadcast %cst_38 : f32 to vector<1x8x256xf32>
    %77 = arith.maximumf %75, %76 : vector<1x8x256xf32>
    %c0_39 = arith.constant 0 : index
    %c0_40 = arith.constant 0 : index
    %78 = vector.load %arg8[%c0_39, %c0_40] : memref<8x4xf32, #tpu.memory_space<vmem>>, vector<8x4xf32>
    %79 = vector.shape_cast %78 : vector<8x4xf32> to vector<1x8x4xf32>
    "tpu.trace_start"() <{level = 10 : i32, message = "boi,bip->bop"}> : () -> ()
    %cst_41 = arith.constant dense<0.000000e+00> : vector<1x8x256xf32>
    %80 = tpu.matmul %79, %1, %cst_41 {dimension_numbers = #tpu.dot_dimension_numbers<[2], [1], [1], [2], [0, 0, 0, 1, 1, 2], [0], [0]>} : vector<1x8x4xf32>, vector<1x4x256xf32>, vector<1x8x256xf32> -> vector<1x8x256xf32>
    "tpu.trace_stop"() : () -> ()
    %81 = arith.addf %80, %77 : vector<1x8x256xf32>
    %c0_42 = arith.constant 0 : index
    %c0_43 = arith.constant 0 : index
    %c0_44 = arith.constant 0 : index
    %82 = vector.load %arg9[%c0_42, %c0_43, %c0_44] : memref<1x8x256xf32, #tpu.memory_space<vmem>>, vector<1x8x256xf32>
    tpu.vector_store %arg9[%c0_42, %c0_43, %c0_44], %81 {strides = array<i32>} : memref<1x8x256xf32, #tpu.memory_space<vmem>>, vector<1x8x256xf32>,
    return
  }
  func.func @transform_0(%arg0: i32) -> (i32, i32, i32, i32) {
    %c0_i32 = arith.constant 0 : i32
    %c0_i32_0 = arith.constant 0 : i32
    %c0_i32_1 = arith.constant 0 : i32
    %c0_i32_2 = arith.constant 0 : i32
    return %arg0, %c0_i32, %c0_i32_0, %c0_i32_1 : i32, i32, i32, i32
  }
  func.func @transform_1(%arg0: i32) -> (i32, i32) {
    %c0_i32 = arith.constant 0 : i32
    %c0_i32_0 = arith.constant 0 : i32
    %c0_i32_1 = arith.constant 0 : i32
    return %c0_i32, %c0_i32_0 : i32, i32
  }
  func.func @transform_2(%arg0: i32) -> (i32, i32) {
    %c0_i32 = arith.constant 0 : i32
    %c0_i32_0 = arith.constant 0 : i32
    %c0_i32_1 = arith.constant 0 : i32
    return %c0_i32, %c0_i32_0 : i32, i32
  }
  func.func @transform_3(%arg0: i32) -> (i32, i32, i32) {
    %c0_i32 = arith.constant 0 : i32
    %c0_i32_0 = arith.constant 0 : i32
    %c0_i32_1 = arith.constant 0 : i32
    %c0_i32_2 = arith.constant 0 : i32
    return %c0_i32, %c0_i32_0, %c0_i32_1 : i32, i32, i32
  }
  func.func @transform_4(%arg0: i32) -> (i32, i32) {
    %c0_i32 = arith.constant 0 : i32
    %c0_i32_0 = arith.constant 0 : i32
    %c0_i32_1 = arith.constant 0 : i32
    return %c0_i32, %c0_i32_0 : i32, i32
  }
  func.func @transform_5(%arg0: i32) -> (i32, i32) {
    %c0_i32 = arith.constant 0 : i32
    %c0_i32_0 = arith.constant 0 : i32
    %c0_i32_1 = arith.constant 0 : i32
    return %c0_i32, %c0_i32_0 : i32, i32
  }
  func.func @transform_6(%arg0: i32) -> (i32, i32) {
    %c0_i32 = arith.constant 0 : i32
    %c0_i32_0 = arith.constant 0 : i32
    %c0_i32_1 = arith.constant 0 : i32
    return %c0_i32, %c0_i32_0 : i32, i32
  }
  func.func @transform_7(%arg0: i32) -> (i32, i32) {
    %c0_i32 = arith.constant 0 : i32
    %c0_i32_0 = arith.constant 0 : i32
    %c0_i32_1 = arith.constant 0 : i32
    return %c0_i32, %c0_i32_0 : i32, i32
  }
  func.func @transform_8(%arg0: i32) -> (i32, i32, i32) {
    %c0_i32 = arith.constant 0 : i32
    %c0_i32_0 = arith.constant 0 : i32
    %c0_i32_1 = arith.constant 0 : i32
    return %arg0, %c0_i32, %c0_i32_0 : i32, i32, i32
  }
}

</mosaic_0001>

<bundles_post_ra>
// kernel: tpu_custom_call.1
= control target key start
LH: loop header
LB: loop body
LE: loop exit
PB: predicated region body
PF: predicated region fallthrough
CT: control target
= control target key end

     0   :  { %13 = vsyncpa [#allocation3], 0  ;;  %s1227_s0 = inlined_call_operand.vmem [shape: f32[2,2,4,256], index: 0, kind: input, shape index: {}]   ;;  %s1228_s1 = inlined_call_operand.vmem [shape: f32[4,4], index: 1, kind: input, shape index: {}]   ;;  %s1229_s2 = inlined_call_operand.vmem [shape: f32[4,1], index: 2, kind: input, shape index: {}]   ;;  %s1230_s3 = inlined_call_operand.hbm [shape: f32[9,4,256], index: 3, kind: input, shape index: {}]   ;;  %s1231_s4 = inlined_call_operand.vmem [shape: f32[4,1], index: 4, kind: input, shape index: {}]   ;;  %s1232_s5 = inlined_call_operand.vmem [shape: f32[8,4], index: 5, kind: input, shape index: {}]   ;;  %s1233_s6 = inlined_call_operand.vmem [shape: f32[8,1], index: 6, kind: input, shape index: {}]   ;;  %s1234_s7 = inlined_call_operand.vmem [shape: f32[8,4], index: 7, kind: input, shape index: {}]   ;;  %s1235_s8 = inlined_call_operand.hbm [shape: f32[2,8,256], index: 8, kind: output, shape index: {}]  }
   0x1   :  { %14 = vsyncpa [#allocation4], 0 }
   0x2   :  { %16 = vsyncpa [#allocation4 + $0x1], 0  ;;  %s1058_s27 = smov 0   ;;  %s1060_s28 = smov 0  }
   0x3   :  { %s1062_s29 = smov 0   ;;  %s1064_s30 = smov 0  }
   0x4 LB: > { %s1079_s9 = sadd.s32 4294967295, %s996_s30   ;;  %s813_s10 = sadd.s32 4294967294, %s996_s30   ;;  %s996_s30 = sphi %s1064_s30, %s1243_s30   ;;  %s992_s29 = sphi %s1062_s29, %s1242_s29   ;;  %s988_s28 = sphi %s1060_s28, %s1241_s28   ;;  %s984_s27 = sphi %s1058_s27, %s1240_s27  }
   0x5   : > { %s1083_s11 = sadd.s32 1, %s996_s30   ;;  %s202_s12 = sadd.s32 1, %s992_s29 }
   0x6   : > { %s199_s13 = ssub.s32 %s996_s30, %s1083_s11  ;;  %p212_p0 = scmp.ne.s32.totalorder %s992_s29, %s988_s28 }
   0x7   : > { %p200_p1 = scmp.eq.s32.totalorder %s199_s13, 0  ;;  %p213_p2 = scmp.eq.s32.totalorder %s1079_s9, 1 }
   0x8   : > { %p218_p3 = scmp.ne.s32.totalorder %s988_s28, %s984_s27  ;;  %p219_p4 = scmp.eq.s32.totalorder %s813_s10, 1 }
   0x9   : > { %s1094_s14 = scalar_select %p200_p1, %s992_s29, %s202_s12  }
   0xa   : > { %p1096_p5 = por %p213_p2, %p212_p0  ;;  %p1100_p6 = por %p219_p4, %p218_p3 }
   0xb   : > { %p814_p7 = scmp.ge.s32.totalorder %s996_s30, 1  ;;  %p226_p8 = scmp.lt.s32.totalorder %s996_s30, 3 }
   0xc   : > { %s1237_s16 = scalar_select %p1100_p6, 1, 0 }
   0xd   : > { %p853_p9 = scmp.eq.s32.totalorder %s1079_s9, 0  ;;  %p1107_p10 = pnand %p814_p7, %p226_p8 }
   0xe   : > { %s998_s18 = smov [#allocation2]  }
   0xf   : > { %s244_s19 = sshll.u32 %s998_s18, 4  ;;  %p845_p11 = pneg %p1107_p10  ;;  %s245_s19 = int_to_ptr.vmem [resolvable:$true] %s244_s19 }
  0x10   : > { %s917_s20 = scalar_lea.vmem %s245_s19, 1152  ;;  %p925_p3 = scmp.lt.s32.totalorder %s245_s19, %s245_s19 }
  0x11   : > { %p846_p12 = pnand %p853_p9, %p845_p11  ;;  %p918_p0 = scmp.ne.s32.totalorder %s245_s19, %s917_s20 }
  0x12   : > { %p926_p4 = scmp.lt.s32.totalorder %s917_s20, %s917_s20 }
  0x13   : > { %p908_p13 = pneg %p846_p12 }
  0x14   : > { %p927_p6 = por %p926_p4, %p925_p3 }
  0x15   : > { %p920_p1 = pnand %p918_p0, %p908_p13 }
  0x17   : > { %p921_p2 = pneg %p920_p1 }
  0x19   : > { %p928_p7 = pnand %p927_p6, %p921_p2 }
  0x1b   : > { %931 = shalt.err (!%p928_p7)
}
  0x1c   : > { %s999_s21 = smov 128   ;;  %s1000_s22 = smov 8  }
  0x1d   : > { %848 = dma.hbm_to_vmem [thread:$0]  (!%p846_p12), %s1230_s3, 1152, %s245_s19, [#allocation3], %s999_s21, %s999_s21, %s1000_s22  }
  0x1e   : > { %280 = sbr.rel (%p1107_p10) target bundleno = 622 (0x26e), region = 52 }
  0x23   : > { %975 = dma.done.wait (%p853_p9), [#allocation3], 1152  }
  0x24   : > { %977 = vsyncadd (%p853_p9), [#allocation3], 4294966144  ;;  %p314_p8 = scmp.lt.s32.totalorder %s1079_s9, 1  ;;  %v1001_v0 = vmov 0.0   ;;  %v1002_v1 = vmov 0   ;;  %vm335_vm0 = vcmask 1043456   ;;  %v417_v21 = vlaneseq }
  0x25   : > { %404 = vmatprep.mubr.f32.mxu0 %v1001_v0  ;;  %635 = vmatprep.mubr.f32.mxu1 %v1001_v0  ;;  %v323_v6 = vld [vmem:[%s1229_s2] sm:$0xf]  ;;  %vm331_vm1 = vcmask 31744   ;;  %s1003_s21 = smov 16   ;;  %s1004_s22 = smov 17   ;;  %v436_v36 = vld [vmem:[#allocation2 + $0x8] sm:$0xff] }
  0x26   : > { %s315_s25 = scalar_select %p314_p8, %s1079_s9, 1  ;;  %902 = vset.pattern.permute.xlu0 %v1002_v1  ;;  %903 = vset.pattern.permute.xlu1 %v1002_v1  ;;  %v322_v7 = vld [vmem:[%s1228_s1] sm:$0xf]  ;;  %v1173_v24 = vand.u32 127, %v417_v21  ;;  %v451_v44 = vld [vmem:[#allocation2 + $0x10] sm:$0xff]  ;;  %v466_v50 = vld [vmem:[#allocation2 + $0x18] sm:$0xff] }
  0x27   : > { %326 = vperm.xlu0 %902, %v323_v6   ;;  %s1005_s23 = smov 15   ;;  %s1006_s24 = smov 1   ;;  %v541_v16 = vld [vmem:[%s1231_s4] sm:$0xf]  ;;  %v489_v61 = vld [vmem:[#allocation2 + $0x28] sm:$0xff] }
  0x28   : > { %s837_s26 = sshll.u32 %s315_s25, 4  ;;  %s1007_s25 = smov 127   ;;  %v556_v17 = vld [vmem:[%s1233_s6] sm:$0xff]  ;;  %vm432_vm2 = vcmp.lt.s32.totalorder %v1173_v24, 16  ;;  %vm447_vm3 = vcmp.lt.s32.totalorder %v1173_v24, 15  ;;  %vm462_vm4 = vcmp.lt.s32.totalorder %v1173_v24, 1 }
  0x29   : > { %s318_s13 = scalar_lea.vmem %s1227_s0, %s837_s26  ;;  %s1008_s26 = smov 113   ;;  %v644_v18 = vld [vmem:[%s1234_s7] sm:$0xff]  ;;  %vm419_vm5 = vcmp.lt.s32.totalorder %v1173_v24, 17  ;;  %vm485_vm6 = vcmp.lt.s32.totalorder %v1173_v24, 127  ;;  %vm500_vm7 = vcmp.lt.s32.totalorder %v1173_v24, 113  ;;  %vm515_vm8 = vcmp.lt.s32.totalorder %v1173_v24, 112 }
  0x2a   : > { %v319_v2 = vld [vmem:[%s318_s13] sm:$0xff]  ;;  %v822_v3 = vld [vmem:[%s318_s13 + $0x8] sm:$0xff]  ;;  %s1009_s10 = smov 112   ;;  %s1010_s12 = smov 111   ;;  %vm530_vm9 = vcmp.lt.s32.totalorder %v1173_v24, 111 }
  0x2b   : > { %v330_v4 = vcombine.high %v822_v3, %v822_v3  ;;  %v646_v5 = vcombine.high %v319_v2, %v319_v2  ;;  %v422_v39 = vld [vmem:[#allocation2] sm:$0xff] }
  0x2c   : > { %v474_v55 = vld [vmem:[#allocation2 + $0x20] sm:$0xff] }
  0x2d   : > { %823 = vmatprep.subr.msk.mxu0 %vm335_vm0, %v330_v4 }
  0x2e   : > { %824 = vmatpush1.msk.msra.mxu0 %vm335_vm0, %v822_v3 }
  0x2f   : > { %825 = vmatmul.mubr.msk.f32.vlgmr.msra.gmra.mxu0 %vm331_vm1, %v322_v7  ;;  %829 = vmatprep.subr.msk.mxu0 %vm335_vm0, %v646_v5  ;;  %v504_v5 = vld [vmem:[#allocation2 + $0x30] sm:$0xff] }
  0x30   : > { %830 = vmatpush1.msk.msra.mxu0 %vm335_vm0, %v319_v2  ;;  %718 = vmatprep.mubr.f32.mxu0 %v1001_v0 }
  0x33   : > { %831 = vmatmul.mubr.msk.f32.vlgmr.msra.gmra.mxu0 %vm331_vm1, %v644_v18  ;;  %v519_v18 = vld [vmem:[#allocation2 + $0x38] sm:$0xff] }
  0xa2   : > { %v327_v8 = vpop.permute.xlu0 %326 }
  0xef   : > { %v406_v9 = vpop.f32.mrf.mxu0 }
  0xf0   : > { %v407_v10 = vadd.f32 %v406_v9, %v327_v8 }
  0xf1   : > { %v408_v11 = vpop.f32.mrf.mxu0 }
  0xf2   : > { %v1140_v12 = vmax.f32 %v407_v10, 0.0  ;;  %v409_v13 = vadd.f32 %v408_v11, %v327_v8  ;;  %v1011_v11 = vmov 839922192  }
  0xf4   : > { %v1142_v14 = vmax.f32 %v409_v13, 0.0  ;;  %428 = vrot.lane.b32.xlu1 %v1140_v12, %s1003_s21  ;;  %413 = vrot.lane.b32.xlu0 %v1140_v12, %s1004_s22  ;;  %v547_v13 = vunpack.c.l.s4 %v1011_v11 }
  0xf6   : > { %v477_v15 = vcombine.low %v1140_v12, %v1142_v14 }
  0xf8   : > { %443 = vrot.lane.b32.xlu1 %v1140_v12, %s1005_s23  ;;  %430 = vrot.lane.b32.xlu0 %v1142_v14, %s1003_s21  ;;  %v479_v1 = vmul.f32 %v477_v15, %v474_v55 }
  0xfc   : > { %458 = vrot.lane.b32.xlu1 %v1140_v12, %s1006_s24  ;;  %445 = vrot.lane.b32.xlu0 %v1142_v14, %s1005_s23 }
 0x100   : > { %481 = vrot.lane.b32.xlu1 %v1140_v12, %s1007_s25  ;;  %460 = vrot.lane.b32.xlu0 %v1142_v14, %s1006_s24  ;;  %s311_s24 = sand.u32 1, %s988_s28  }
 0x101   : > { %s728_s19 = scalar_lea.sflag [#allocation4], %s311_s24 }
 0x104   : > { %415 = vrot.lane.b32.xlu1 %v1142_v14, %s1004_s22  ;;  %483 = vrot.lane.b32.xlu0 %v1142_v14, %s1007_s25  ;;  %s819_s25 = sshll.u32 %s311_s24, 4 }
 0x108   : > { %496 = vrot.lane.b32.xlu1 %v1140_v12, %s1008_s26  ;;  %498 = vrot.lane.b32.xlu0 %v1142_v14, %s1008_s26  ;;  %s838_s26 = sshll.u32 %s1079_s9, 8  ;;  %s1012_s9 = smov [#allocation5]  }
 0x109   : > { %s740_s18 = scalar_lea.hbm %s1235_s8, %s838_s26  ;;  %s936_s21 = sshll.u32 %s1012_s9, 4  ;;  %s937_s21 = int_to_ptr.vmem [resolvable:$false] %s936_s21 }
 0x10a   : > { %s938_s22 = scalar_lea.vmem %s937_s21, 512 }
 0x10c   : > { %511 = vrot.lane.b32.xlu1 %v1140_v12, %s1009_s10  ;;  %513 = vrot.lane.b32.xlu0 %v1142_v14, %s1009_s10  ;;  %s313_s10 = scalar_lea.vmem [#allocation5], %s819_s25 }
 0x110   : > { %526 = vrot.lane.b32.xlu1 %v1140_v12, %s1010_s12  ;;  %528 = vrot.lane.b32.xlu0 %v1142_v14, %s1010_s12  ;;  %s742_s12 = sshll.u32 %s313_s10, 4  ;;  %s743_s12 = int_to_ptr.vmem [resolvable:$true] %s742_s12 }
 0x111   : > { %s932_s20 = scalar_lea.vmem %s743_s12, 256  ;;  %p939_p11 = scmp.lt.s32.totalorder %s743_s12, %s937_s21 }
 0x112   : > { %p933_p6 = scmp.ne.s32.totalorder %s743_s12, %s932_s20  ;;  %p940_p12 = scmp.lt.s32.totalorder %s938_s22, %s932_s20 }
 0x114   : > { %544 = vperm.xlu1 %903, %v541_v16   ;;  %559 = vperm.xlu0 %902, %v556_v17   ;;  %p934_p9 = pnand %p933_p6, %p1096_p5  ;;  %p941_p13 = por %p940_p12, %p939_p11 }
 0x116   : > { %p935_p10 = pneg %p934_p9 }
 0x118   : > { %p942_p0 = pnand %p941_p13, %p935_p10 }
 0x166   : > { %v429_v19 = vpop.permute.xlu1 %428  ;;  %v414_v20 = vpop.permute.xlu0 %413 }
 0x16a   : > { %v444_v22 = vpop.permute.xlu1 %443  ;;  %v431_v23 = vpop.permute.xlu0 %430 }
 0x16b   : > { %v433_v29 = vsel %vm432_vm2, %v429_v19, %v431_v23  ;;  %v434_v30 = vsel %vm432_vm2, %v431_v23, %v429_v19  ;;  %v548_v19 = vunpack.c.0.s8 %v547_v13 }
 0x16c   : > { %v439_v33 = vcombine.low %v434_v30, %v433_v29 }
 0x16e   : > { %v459_v25 = vpop.permute.xlu1 %458  ;;  %v446_v26 = vpop.permute.xlu0 %445  ;;  %v441_v45 = vmul.f32 %v439_v33, %v436_v36  ;;  %v555_v33 = vld [vmem:[%s1232_s5] sm:$0xff] }
 0x16f   : > { %v448_v31 = vsel %vm447_vm3, %v444_v22, %v446_v26  ;;  %v449_v32 = vsel %vm447_vm3, %v446_v26, %v444_v22 }
 0x170   : > { %v454_v42 = vcombine.low %v449_v32, %v448_v31 }
 0x172   : > { %v482_v27 = vpop.permute.xlu1 %481  ;;  %v461_v28 = vpop.permute.xlu0 %460  ;;  %v456_v53 = vmul.f32 %v454_v42, %v451_v44 }
 0x173   : > { %v463_v37 = vsel %vm462_vm4, %v459_v25, %v461_v28  ;;  %v464_v38 = vsel %vm462_vm4, %v461_v28, %v459_v25  ;;  %v534_v25 = vld [vmem:[#allocation2 + $0x40] sm:$0xff] }
 0x174   : > { %v469_v46 = vcombine.low %v464_v38, %v463_v37  ;;  %v720_v37 = vpop.f32.mrf.mxu0 }
 0x176   : > { %v416_v34 = vpop.permute.xlu1 %415  ;;  %v484_v35 = vpop.permute.xlu0 %483  ;;  %v471_v56 = vmul.f32 %v469_v46, %v466_v50 }
 0x177   : > { %v420_v40 = vsel %vm419_vm5, %v414_v20, %v416_v34  ;;  %v421_v41 = vsel %vm419_vm5, %v416_v34, %v414_v20  ;;  %v486_v51 = vsel %vm485_vm6, %v482_v27, %v484_v35  ;;  %v487_v52 = vsel %vm485_vm6, %v484_v35, %v482_v27  ;;  %v722_v42 = vpop.f32.mrf.mxu0 }
 0x178   : > { %v425_v43 = vcombine.low %v421_v41, %v420_v40  ;;  %v492_v58 = vcombine.low %v486_v51, %v487_v52  ;;  %v550_v20 = vshrl.u32 %v417_v21, 7 }
 0x17a   : > { %v427_v47 = vmul.f32 %v425_v43, %v422_v39  ;;  %v497_v48 = vpop.permute.xlu1 %496  ;;  %v499_v49 = vpop.permute.xlu0 %498  ;;  %v494_v3 = vmul.f32 %v492_v58, %v489_v61  ;;  %v551_v26 = vsub.s32 %v548_v19, %v550_v20 }
 0x17b   : > { %v501_v62 = vsel %vm500_vm7, %v497_v48, %v499_v49  ;;  %v502_v63 = vsel %vm500_vm7, %v499_v49, %v497_v48 }
 0x17c   : > { %v442_v54 = vadd.f32 %v441_v45, %v427_v47  ;;  %v507_v4 = vcombine.low %v501_v62, %v502_v63 }
 0x17e   : > { %v457_v57 = vadd.f32 %v456_v53, %v442_v54  ;;  %v512_v59 = vpop.permute.xlu1 %511  ;;  %v514_v60 = vpop.permute.xlu0 %513  ;;  %v509_v16 = vmul.f32 %v507_v4, %v504_v5 }
 0x17f   : > { %v516_v6 = vsel %vm515_vm8, %v512_v59, %v514_v60  ;;  %v517_v7 = vsel %vm515_vm8, %v514_v60, %v512_v59 }
 0x180   : > { %v472_v0 = vadd.f32 %v471_v56, %v457_v57  ;;  %v522_v17 = vcombine.low %v516_v6, %v517_v7 }
 0x182   : > { %v480_v2 = vadd.f32 %v479_v1, %v472_v0  ;;  %v527_v9 = vpop.permute.xlu1 %526  ;;  %v529_v10 = vpop.permute.xlu0 %528  ;;  %v524_v22 = vmul.f32 %v522_v17, %v519_v18 }
 0x183   : > { %v531_v12 = vsel %vm530_vm9, %v527_v9, %v529_v10  ;;  %v532_v14 = vsel %vm530_vm9, %v529_v10, %v527_v9 }
 0x184   : > { %v495_v8 = vadd.f32 %v494_v3, %v480_v2  ;;  %v537_v23 = vcombine.low %v531_v12, %v532_v14 }
 0x186   : > { %v510_v15 = vadd.f32 %v509_v16, %v495_v8  ;;  %v539_v28 = vmul.f32 %v537_v23, %v534_v25 }
 0x188   : > { %v525_v27 = vadd.f32 %v524_v22, %v510_v15 }
 0x18a   : > { %v540_v29 = vadd.f32 %v539_v28, %v525_v27 }
 0x18f   : > { %v545_v24 = vpop.permute.xlu1 %544  ;;  %v560_v21 = vpop.permute.xlu0 %559 }
 0x190   : > { %v552_v30 = vrot.slane %v545_v24, %v551_v26 }
 0x192   : > { %v554_v31 = vadd.f32 %v552_v30, %v540_v29 }
 0x194   : > { %v563_v32 = vcombine.high %v554_v31, %v554_v31 }
 0x196   : > { %826 = vmatprep.subr.msk.mxu1 %vm335_vm0, %v563_v32 }
 0x197   : > { %827 = vmatpush1.msk.msra.mxu1 %vm335_vm0, %v554_v31 }
 0x198   : > { %828 = vmatmul.mubr.msk.f32.vlgmr.msra.gmra.mxu1 %vm331_vm1, %v555_v33 }
 0x258   : > { %v637_v34 = vpop.f32.mrf.mxu1 }
 0x259   : > { %v638_v35 = vadd.f32 %v637_v34, %v560_v21 }
 0x25a   : > { %v639_v36 = vpop.f32.mrf.mxu1 }
 0x25b   : > { %v642_v38 = vmax.f32 %v638_v35, 0.0  ;;  %v640_v39 = vadd.f32 %v639_v36, %v560_v21 }
 0x25d   : > { %v643_v40 = vmax.f32 %v640_v39, 0.0  ;;  %v721_v41 = vadd.f32 %v720_v37, %v642_v38 }
 0x25f   : > { %725 = vst [vmem:[%s313_s10] sm:$0xff] %v721_v41  ;;  %v723_v43 = vadd.f32 %v722_v42, %v643_v40 }
 0x261   : > { %726 = vst [vmem:[%s313_s10 + $0x8] sm:$0xff] %v723_v43 }
 0x262   : > { %945 = shalt.err (!%p942_p0)
}
 0x263   : > { %s946_s23 = scalar_lea.hbm %s740_s18, 256  ;;  %s950_s26 = scalar_lea.hbm %s1235_s8, 512 }
 0x264   : > { %p947_p1 = scmp.ne.s32.totalorder %s740_s18, %s946_s23  ;;  %p951_p4 = scmp.lt.s32.totalorder %s740_s18, %s1235_s8 }
 0x265   : > { %p952_p7 = scmp.lt.s32.totalorder %s950_s26, %s946_s23 }
 0x266   : > { %p948_p2 = pnand %p947_p1, %p1096_p5 }
 0x267   : > { %p953_p8 = por %p952_p7, %p951_p4 }
 0x268   : > { %p949_p3 = pneg %p948_p2 }
 0x26a   : > { %p954_p6 = pnand %p953_p8, %p949_p3 }
 0x26c   : > { %957 = shalt.err (!%p954_p6)
}
 0x26d   : > { %843 = dma.vmem_to_hbm [thread:$0]  (%p1096_p5), %s743_s12, 256, %s740_s18, %s728_s19  }
 0x26e PF: > { %p855_p9 = scmp.ge.s32.totalorder %s996_s30, 2  ;;  %s754_s17 = sand.u32 1, %s984_s27  }
 0x26f   : > { %p1239_p10 = scmp.ne.s32.totalorder %s1237_s16, 0  ;;  %s755_s20 = scalar_lea.sflag [#allocation4], %s754_s17 }
 0x271   : > { %p850_p11 = pnand %p855_p9, %p1239_p10 }
 0x273   : > { %p851_p12 = pneg %p850_p11 }
 0x275   : > { %979 = dma.done.wait (%p851_p12), %s755_s20, 256  }
 0x276   : > { %981 = vsyncadd (%p851_p12), %s755_s20, 4294967040  ;;  %p19_p13 = scmp.ge.s32.totalorder %s1083_s11, 4   ;;  %s1240_s27 = smov %s988_s28 }
 0x277   : > { %s1241_s28 = smov %s992_s29  ;;  %s1242_s29 = smov %s1094_s14 }
 0x278   : > { %s1243_s30 = smov %s1083_s11  ;;  %21 = sbr.rel (!%p19_p13) target bundleno = 4 (0x4), region = 101 }
 0x27d   :  { %760 = vsyncpa [#allocation3], 1 }
 0x27e   :  { %762 = vsyncpa [#allocation3 + $0x1], 1 }
 0x27f   :  { %763 = vsyncpa [#allocation4], 1 }
 0x280   :  { %765 = vsyncpa [#allocation4 + $0x1], 1 }

</bundles_post_ra>
